<compile_context>
chip_gen: v6e
topology: v6e:2x2x1
jax: 0.10.0
libtpu: 0.0.40
codegen_flags: <defaults>
</compile_context>

<pallas_src>
import functools

import jax
import jax.numpy as jnp
from jax.experimental import pallas as pl
from jax.experimental.pallas import tpu as pltpu


def _round_up(x, m):
    return ((x + m - 1) // m) * m


def _bert_output_kernel(x_ref, wt_ref, b_ref, res_ref, lnw_ref, lnb_ref,
                        o_ref, *, eps):
    """Grid = (M_tiles,). Weight is VMEM-resident; one MXU matmul per tile."""
    # bf16 (or native) operands, f32 accumulation on the MXU.
    h = jnp.dot(x_ref[...], wt_ref[...], preferred_element_type=jnp.float32)
    h = h + b_ref[...].astype(jnp.float32)                 # dense bias
    # TODO(synk): training-mode dropout (hidden_dropout_prob) not implemented;
    # forward assumes eval (dropout == identity).
    h = h + res_ref[...].astype(jnp.float32)               # residual add
    # BertLayerNorm: eps inside the sqrt, per-feature affine (biased variance).
    u = jnp.mean(h, axis=-1, keepdims=True)
    d = h - u
    s = jnp.mean(d * d, axis=-1, keepdims=True)
    h = d * jax.lax.rsqrt(s + eps)
    h = lnw_ref[...].astype(jnp.float32) * h + lnb_ref[...].astype(jnp.float32)
    o_ref[...] = h.astype(o_ref.dtype)


def prepare_bert_output_params(params, mxu_dtype=jnp.bfloat16):
    """One-time prep (outside the hot path): transpose torch-layout (H, I)
    weight to (I, H) and cast it to the MXU dtype; reshape the vectors."""
    return {
        "dense_wt": jnp.asarray(params["dense_w"]).T.astype(mxu_dtype),   # (I, H)
        "dense_b": jnp.asarray(params["dense_b"], jnp.float32).reshape(1, -1),
        "ln_w": jnp.asarray(params["ln_w"], jnp.float32).reshape(1, -1),
        "ln_b": jnp.asarray(params["ln_b"], jnp.float32).reshape(1, -1),
    }


def _choose_tm(M):
    """Token tile: large enough to be MXU-bound, bounded for VMEM, and (for
    large M) leaving >= 2 blocks on the megacore 'parallel' axis."""
    if M <= 256:
        return _round_up(M, 16)          # bf16 sublane quantum
    return min(512, _round_up(-(-M // 2), 128))


def _vmem_limit_bytes():
    # ~75% of physical VMEM: 48 MiB on v7x (64 MiB), 96 MiB on v5e/v6e (128 MiB).
    try:
        cap = pltpu.get_tpu_info().vmem_capacity_bytes
    except Exception:
        cap = 64 << 20
    return int(min(cap * 3 // 4, 100 << 20))


def bert_output(hidden_states, input_tensor, prepared_params, *, eps=1e-12,
                tm=None):
    """BertOutput forward (eval mode).

    hidden_states: (..., I)   intermediate activations
    input_tensor:  (..., H)   residual branch
    prepared_params: from prepare_bert_output_params()
    returns (..., H)
    """
    dense_wt = prepared_params["dense_wt"]   # (I, H), MXU dtype (bf16)
    dense_b = prepared_params["dense_b"]     # (1, H) f32
    ln_w = prepared_params["ln_w"]           # (1, H) f32
    ln_b = prepared_params["ln_b"]           # (1, H) f32

    I, H = dense_wt.shape
    assert hidden_states.shape[-1] == I
    assert input_tensor.shape[-1] == H
    out_dtype = hidden_states.dtype

    lead = hidden_states.shape[:-1]
    x2d = hidden_states.reshape(-1, I)
    r2d = input_tensor.reshape(-1, H)
    M = x2d.shape[0]

    # bf16 MXU operands (accumulation is f32 inside the kernel).
    if x2d.dtype != dense_wt.dtype:
        x2d = x2d.astype(dense_wt.dtype)

    if tm is None:
        tm = _choose_tm(M)
    M_pad = _round_up(M, tm)
    if M_pad != M:
        x2d = jnp.pad(x2d, ((0, M_pad - M), (0, 0)))
        r2d = jnp.pad(r2d, ((0, M_pad - M), (0, 0)))

    grid = (M_pad // tm,)

    out = pl.pallas_call(
        functools.partial(_bert_output_kernel, eps=eps),
        out_shape=jax.ShapeDtypeStruct((M_pad, H), out_dtype),
        grid_spec=pltpu.PrefetchScalarGridSpec(
            num_scalar_prefetch=0,
            grid=grid,
            in_specs=[
                pl.BlockSpec((tm, I), lambda i: (i, 0)),   # x tile (streamed)
                pl.BlockSpec((I, H), lambda i: (0, 0)),    # W^T: VMEM-resident
                pl.BlockSpec((1, H), lambda i: (0, 0)),    # dense bias
                pl.BlockSpec((tm, H), lambda i: (i, 0)),   # residual tile
                pl.BlockSpec((1, H), lambda i: (0, 0)),    # ln gamma
                pl.BlockSpec((1, H), lambda i: (0, 0)),    # ln beta
            ],
            out_specs=pl.BlockSpec((tm, H), lambda i: (i, 0)),
        ),
        compiler_params=pltpu.CompilerParams(
            dimension_semantics=("parallel",),
            vmem_limit_bytes=_vmem_limit_bytes(),
        ),
    )(x2d, dense_wt, dense_b, r2d, ln_w, ln_b)

    if M_pad != M:
        out = out[:M]
    return out.reshape(*lead, H)


def _reference(hidden_states, input_tensor, params, eps=1e-12,
               mxu_dtype=jnp.bfloat16):
    """Pure-JAX reference mirroring the PyTorch forward (eval mode) with the
    same bf16-matmul / f32-accumulation path as the kernel."""
    x = hidden_states.astype(mxu_dtype)
    wt = jnp.asarray(params["dense_w"]).T.astype(mxu_dtype)
    h = jnp.dot(x, wt, preferred_element_type=jnp.float32) + params["dense_b"]
    h = h + input_tensor.astype(jnp.float32)
    u = jnp.mean(h, axis=-1, keepdims=True)
    s = jnp.mean((h - u) ** 2, axis=-1, keepdims=True)
    h = (h - u) / jnp.sqrt(s + eps)
    return params["ln_w"] * h + params["ln_b"]


if __name__ == "__main__":
    key = jax.random.PRNGKey(0)
    batch, seq, hidden, intermediate = 2, 8, 32, 128

    k = jax.random.split(key, 6)
    params = {
        "dense_w": jax.random.normal(k[0], (hidden, intermediate), jnp.float32) * 0.05,
        "dense_b": jax.random.normal(k[1], (hidden,), jnp.float32) * 0.02,
        "ln_w": 1.0 + 0.1 * jax.random.normal(k[2], (hidden,), jnp.float32),
        "ln_b": 0.02 * jax.random.normal(k[3], (hidden,), jnp.float32),
    }
    hidden_states = jax.random.normal(k[4], (batch, seq, intermediate), jnp.float32)
    input_tensor = jax.random.normal(k[5], (batch, seq, hidden), jnp.float32)

    # One-time param prep (transpose + bf16 cast) outside the hot path.
    prepared = prepare_bert_output_params(params, mxu_dtype=jnp.bfloat16)

    out = bert_output(hidden_states, input_tensor, prepared)
    out = jax.block_until_ready(out)

    ref = _reference(hidden_states, input_tensor, params)
    assert out.shape == (batch, seq, hidden), out.shape
    assert jnp.allclose(out, ref, atol=2e-3, rtol=2e-3), float(
        jnp.max(jnp.abs(out - ref)))

    print("KERNEL_OK")
</pallas_src>

<mosaic_0001>
module attributes {stable_mosaic.version = 11 : i64} {
  func.func @_bert_output_kernel(%arg0: i32, %arg1: memref<16x128xbf16, #tpu.memory_space<vmem>>, %arg2: memref<128x32xbf16, #tpu.memory_space<vmem>>, %arg3: memref<1x32xf32, #tpu.memory_space<vmem>>, %arg4: memref<16x32xf32, #tpu.memory_space<vmem>>, %arg5: memref<1x32xf32, #tpu.memory_space<vmem>>, %arg6: memref<1x32xf32, #tpu.memory_space<vmem>>, %arg7: memref<16x32xf32, #tpu.memory_space<vmem>>) attributes {dimension_semantics = [#tpu.dimension_semantics<parallel>], iteration_bounds = array<i64: 1>, scalar_prefetch = 0 : i64, scratch_operands = 0 : i64, tpu.core_type = #tpu.core_type<tc>, window_params = [{transform_indices = @transform_0, window_bounds = array<i64: 16, 128>}, {pipeline_mode = #tpu.pipeline_mode<synchronous>, transform_indices = @transform_1, window_bounds = array<i64: 128, 32>}, {pipeline_mode = #tpu.pipeline_mode<synchronous>, transform_indices = @transform_2, window_bounds = array<i64: 1, 32>}, {transform_indices = @transform_3, window_bounds = array<i64: 16, 32>}, {pipeline_mode = #tpu.pipeline_mode<synchronous>, transform_indices = @transform_4, window_bounds = array<i64: 1, 32>}, {pipeline_mode = #tpu.pipeline_mode<synchronous>, transform_indices = @transform_5, window_bounds = array<i64: 1, 32>}, {transform_indices = @transform_6, window_bounds = array<i64: 16, 32>}]} {
    %c0 = arith.constant 0 : index
    %c0_0 = arith.constant 0 : index
    %0 = vector.load %arg1[%c0, %c0_0] : memref<16x128xbf16, #tpu.memory_space<vmem>>, vector<16x128xbf16>
    %c0_1 = arith.constant 0 : index
    %c0_2 = arith.constant 0 : index
    %1 = vector.load %arg2[%c0_1, %c0_2] : memref<128x32xbf16, #tpu.memory_space<vmem>>, vector<128x32xbf16>
    %cst = arith.constant dense<0.000000e+00> : vector<16x32xf32>
    %2 = tpu.matmul %0, %1, %cst {dimension_numbers = #tpu.dot_dimension_numbers<[1], [0], [0], [1], [0, 0, 1, 1], [], []>} : vector<16x128xbf16>, vector<128x32xbf16>, vector<16x32xf32> -> vector<16x32xf32>
    %c0_3 = arith.constant 0 : index
    %c0_4 = arith.constant 0 : index
    %3 = vector.load %arg3[%c0_3, %c0_4] : memref<1x32xf32, #tpu.memory_space<vmem>>, vector<1x32xf32>
    %4 = vector.broadcast %3 : vector<1x32xf32> to vector<16x32xf32>
    %5 = arith.addf %2, %4 : vector<16x32xf32>
    %c0_5 = arith.constant 0 : index
    %c0_6 = arith.constant 0 : index
    %6 = vector.load %arg4[%c0_5, %c0_6] : memref<16x32xf32, #tpu.memory_space<vmem>>, vector<16x32xf32>
    %7 = arith.addf %5, %6 : vector<16x32xf32>
    %cst_7 = arith.constant dense<0.000000e+00> : vector<16xf32>
    %8 = vector.multi_reduction <add>, %7, %cst_7 [1] : vector<16x32xf32> to vector<16xf32>
    %9 = vector.shape_cast %8 : vector<16xf32> to vector<16x1xf32>
    %cst_8 = arith.constant 3.200000e+01 : f32
    %10 = vector.broadcast %cst_8 : f32 to vector<16x1xf32>
    %11 = arith.divf %9, %10 : vector<16x1xf32>
    %12 = vector.broadcast %11 : vector<16x1xf32> to vector<16x32xf32>
    %13 = arith.subf %7, %12 : vector<16x32xf32>
    %14 = arith.mulf %13, %13 : vector<16x32xf32>
    %cst_9 = arith.constant dense<0.000000e+00> : vector<16xf32>
    %15 = vector.multi_reduction <add>, %14, %cst_9 [1] : vector<16x32xf32> to vector<16xf32>
    %16 = vector.shape_cast %15 : vector<16xf32> to vector<16x1xf32>
    %cst_10 = arith.constant 3.200000e+01 : f32
    %17 = vector.broadcast %cst_10 : f32 to vector<16x1xf32>
    %18 = arith.divf %16, %17 : vector<16x1xf32>
    %cst_11 = arith.constant 9.99999996E-13 : f32
    %19 = vector.broadcast %cst_11 : f32 to vector<16x1xf32>
    %20 = arith.addf %18, %19 : vector<16x1xf32>
    %21 = math.rsqrt %20 : vector<16x1xf32>
    %22 = vector.broadcast %21 : vector<16x1xf32> to vector<16x32xf32>
    %23 = arith.mulf %13, %22 : vector<16x32xf32>
    %c0_12 = arith.constant 0 : index
    %c0_13 = arith.constant 0 : index
    %24 = vector.load %arg5[%c0_12, %c0_13] : memref<1x32xf32, #tpu.memory_space<vmem>>, vector<1x32xf32>
    %25 = vector.broadcast %24 : vector<1x32xf32> to vector<16x32xf32>
    %26 = arith.mulf %25, %23 : vector<16x32xf32>
    %c0_14 = arith.constant 0 : index
    %c0_15 = arith.constant 0 : index
    %27 = vector.load %arg6[%c0_14, %c0_15] : memref<1x32xf32, #tpu.memory_space<vmem>>, vector<1x32xf32>
    %28 = vector.broadcast %27 : vector<1x32xf32> to vector<16x32xf32>
    %29 = arith.addf %26, %28 : vector<16x32xf32>
    %c0_16 = arith.constant 0 : index
    %c0_17 = arith.constant 0 : index
    %30 = vector.load %arg7[%c0_16, %c0_17] : memref<16x32xf32, #tpu.memory_space<vmem>>, vector<16x32xf32>
    tpu.vector_store %arg7[%c0_16, %c0_17], %29 {strides = array<i32>} : memref<16x32xf32, #tpu.memory_space<vmem>>, vector<16x32xf32>,
    return
  }
  func.func @transform_0(%arg0: i32) -> (i32, i32) {
    %c0_i32 = arith.constant 0 : i32
    %c0_i32_0 = arith.constant 0 : i32
    return %arg0, %c0_i32 : i32, i32
  }
  func.func @transform_1(%arg0: i32) -> (i32, i32) {
    %c0_i32 = arith.constant 0 : i32
    %c0_i32_0 = arith.constant 0 : i32
    %c0_i32_1 = arith.constant 0 : i32
    return %c0_i32, %c0_i32_0 : i32, i32
  }
  func.func @transform_2(%arg0: i32) -> (i32, i32) {
    %c0_i32 = arith.constant 0 : i32
    %c0_i32_0 = arith.constant 0 : i32
    %c0_i32_1 = arith.constant 0 : i32
    return %c0_i32, %c0_i32_0 : i32, i32
  }
  func.func @transform_3(%arg0: i32) -> (i32, i32) {
    %c0_i32 = arith.constant 0 : i32
    %c0_i32_0 = arith.constant 0 : i32
    return %arg0, %c0_i32 : i32, i32
  }
  func.func @transform_4(%arg0: i32) -> (i32, i32) {
    %c0_i32 = arith.constant 0 : i32
    %c0_i32_0 = arith.constant 0 : i32
    %c0_i32_1 = arith.constant 0 : i32
    return %c0_i32, %c0_i32_0 : i32, i32
  }
  func.func @transform_5(%arg0: i32) -> (i32, i32) {
    %c0_i32 = arith.constant 0 : i32
    %c0_i32_0 = arith.constant 0 : i32
    %c0_i32_1 = arith.constant 0 : i32
    return %c0_i32, %c0_i32_0 : i32, i32
  }
  func.func @transform_6(%arg0: i32) -> (i32, i32) {
    %c0_i32 = arith.constant 0 : i32
    %c0_i32_0 = arith.constant 0 : i32
    return %arg0, %c0_i32 : i32, i32
  }
}

</mosaic_0001>

<bundles_post_ra>
// kernel: tpu_custom_call.1
= control target key start
LH: loop header
LB: loop body
LE: loop exit
PB: predicated region body
PF: predicated region fallthrough
CT: control target
= control target key end

     0   :  { %v294_v1 = vmov 0.0   ;;  %vm295_vm0 = vmmov 0   ;;  %s385_s0 = inlined_call_operand.vmem [shape: bf16[16,128], index: 0, kind: input, shape index: {}]   ;;  %s386_s1 = inlined_call_operand.vmem [shape: bf16[128,32], index: 1, kind: input, shape index: {}]   ;;  %s387_s2 = inlined_call_operand.vmem [shape: f32[1,32], index: 2, kind: input, shape index: {}]   ;;  %s388_s3 = inlined_call_operand.vmem [shape: f32[16,32], index: 3, kind: input, shape index: {}]   ;;  %s389_s4 = inlined_call_operand.vmem [shape: f32[1,32], index: 4, kind: input, shape index: {}]   ;;  %s390_s5 = inlined_call_operand.vmem [shape: f32[1,32], index: 5, kind: input, shape index: {}]   ;;  %s391_s6 = inlined_call_operand.hbm [shape: f32[16,32], index: 6, kind: output, shape index: {}]  }
   0x1   :  { %v259_v0 = vld [vmem:[%s386_s1 + $0x38] sm:$0xff]   ;;  %234 = vmatprep.subr.bf16.mxu0 %v294_v1  ;;  %v260_v2 = vld [vmem:[%s386_s1 + $0x30] sm:$0xff]   ;;  %250 = vmatprep.mubr.msk.bf16.mxu0 %vm295_vm0, %v294_v1  ;;  %v261_v3 = vld [vmem:[%s386_s1 + $0x28] sm:$0xff]  }
   0x2   :  { %235 = vmatpush3.bf16.msra.mxu0 %v259_v0 }
   0x3   :  { %236 = vmatprep.subr.bf16.mxu0 %v294_v1 }
   0x6   :  { %237 = vmatpush3.bf16.msra.mxu0 %v260_v2 }
   0x7   :  { %238 = vmatprep.subr.bf16.mxu0 %v294_v1 }
   0x8   :  { %11 = vsyncpa [#allocation3], 0  ;;  %v262_v4 = vld [vmem:[%s386_s1 + $0x20] sm:$0xff]   ;;  %v263_v5 = vld [vmem:[%s386_s1 + $0x18] sm:$0xff]   ;;  %vm149_vm1 = vcmask 261120   ;;  %s296_s21 = smov [#allocation2]  }
   0x9   :  { %v264_v6 = vld [vmem:[%s386_s1 + $0x10] sm:$0xff]   ;;  %v265_v7 = vld [vmem:[%s386_s1 + $0x8] sm:$0xff]   ;;  %v266_v8 = vld [vmem:[%s386_s1] sm:$0xff]   ;;  %s202_s22 = sshll.u32 %s296_s21, 4  ;;  %s203_s22 = int_to_ptr.vmem [resolvable:$true] %s202_s22 }
   0xa   :  { %239 = vmatpush3.bf16.msra.mxu0 %v261_v3  ;;  %v267_v9 = vld [vmem:[%s385_s0] sm:$0xff]   ;;  %v146_v17 = vld [vmem:[%s388_s3 + $0x8] sm:$0xff]  ;;  %s272_s23 = scalar_lea.vmem %s203_s22, 256  ;;  %p277_p1 = scmp.lt.s32.totalorder %s203_s22, %s203_s22 }
   0xb   :  { %240 = vmatprep.subr.bf16.mxu0 %v294_v1  ;;  %v213_v10 = vld [vmem:[%s387_s2] ss:$0 sm:$0xff]  ;;  %p273_p0 = scmp.ne.s32.totalorder %s203_s22, %s272_s23  ;;  %p278_p2 = scmp.lt.s32.totalorder %s272_s23, %s272_s23 }
   0xc   :  { %v145_v12 = vld [vmem:[%s388_s3] sm:$0xff] }
   0xd   :  { %v223_v40 = vld [vmem:[%s389_s4] ss:$0 sm:$0xff]  ;;  %p279_p3 = por %p278_p2, %p277_p1 }
   0xe   :  { %241 = vmatpush3.bf16.msra.mxu0 %v262_v4  ;;  %v224_v42 = vld [vmem:[%s390_s5] ss:$0 sm:$0xff] }
   0xf   :  { %242 = vmatprep.subr.bf16.mxu0 %v294_v1  ;;  %p280_p4 = pnand %p279_p3, %p273_p0 }
  0x12   :  { %243 = vmatpush3.bf16.msra.mxu0 %v263_v5 }
  0x13   :  { %244 = vmatprep.subr.bf16.mxu0 %v294_v1 }
  0x16   :  { %245 = vmatpush3.bf16.msra.mxu0 %v264_v6 }
  0x17   :  { %246 = vmatprep.subr.bf16.mxu0 %v294_v1 }
  0x1a   :  { %247 = vmatpush3.bf16.msra.mxu0 %v265_v7 }
  0x1b   :  { %248 = vmatprep.subr.bf16.mxu0 %v294_v1 }
  0x1e   :  { %249 = vmatpush3.bf16.msra.mxu0 %v266_v8 }
  0x21   :  { %251 = vmatmul.mubr.bf16.vlgmr.msra.gmra.mxu0 %v267_v9 }
  0xe1   :  { %v138_v11 = vpop.f32.mrf.mxu0 }
  0xe2   :  { %v139_v13 = vadd.f32 %v213_v10, %v138_v11 }
  0xe3   :  { %v252_v14 = vpop.f32.mrf.mxu0 }
  0xe4   :  { %v147_v15 = vadd.f32 %v145_v12, %v139_v13 }
  0xe5   :  { %v141_v16 = vpop.f32.mrf.mxu0 }
  0xe6   :  { %v142_v18 = vadd.f32 %v213_v10, %v141_v16  ;;  %v150_v19 = vsel %vm149_vm1, %v147_v15, 0.0 }
  0xe7   :  { %151 = vadd.xlane.f32.xlu0 %v150_v19  ;;  %v253_v20 = vpop.f32.mrf.mxu0 }
  0xe8   :  { %v148_v21 = vadd.f32 %v146_v17, %v142_v18 }
  0xea   :  { %v153_v22 = vsel %vm149_vm1, %v148_v21, 0.0 }
  0xeb   :  { %154 = vadd.xlane.f32.xlu0 %v153_v22 }
 0x170   :  { %v152_v23 = vpop.xlane.xlu0 %151 }
 0x171   :  { %v157_v24 = vmul.f32 0.03125, %v152_v23 }
 0x173   :  { %v159_v25 = vsub.f32 %v147_v15, %v157_v24 }
 0x174   :  { %v155_v26 = vpop.xlane.xlu0 %154 }
 0x175   :  { %v158_v27 = vmul.f32 0.03125, %v155_v26  ;;  %v161_v28 = vmul.f32 %v159_v25, %v159_v25 }
 0x177   :  { %v160_v29 = vsub.f32 %v148_v21, %v158_v27  ;;  %v163_v30 = vsel %vm149_vm1, %v161_v28, 0.0 }
 0x178   :  { %164 = vadd.xlane.f32.xlu1 %v163_v30 }
 0x179   :  { %v162_v31 = vmul.f32 %v160_v29, %v160_v29 }
 0x17b   :  { %v166_v32 = vsel %vm149_vm1, %v162_v31, 0.0 }
 0x17c   :  { %167 = vadd.xlane.f32.xlu1 %v166_v32 }
 0x201   :  { %v165_v33 = vpop.xlane.xlu1 %164 }
 0x202   :  { %v169_v34 = vmul.f32 0.03125, %v165_v33 }
 0x204   :  { %v171_v35 = vadd.f32 1e-12, %v169_v34 }
 0x205   :  { %v168_v36 = vpop.xlane.xlu1 %167 }
 0x206   :  { %268 = vrsqrt.f32 %v171_v35  ;;  %v170_v37 = vmul.f32 0.03125, %v168_v36 }
 0x208   :  { %v172_v38 = vadd.f32 1e-12, %v170_v37 }
 0x20a   :  { %270 = vrsqrt.f32 %v172_v38 }
 0x213   :  { %v269_v39 = vpop.eup %268 }
 0x214   :  { %v175_v41 = vmul.f32 %v269_v39, %v159_v25 }
 0x216   :  { %v184_v43 = vmul.f32 %v223_v40, %v175_v41 }
 0x217   :  { %v271_v44 = vpop.eup %270 }
 0x218   :  { %v176_v45 = vmul.f32 %v271_v44, %v160_v29  ;;  %v193_v46 = vadd.f32 %v224_v42, %v184_v43 }
 0x21a   :  { %v185_v47 = vmul.f32 %v223_v40, %v176_v45  ;;  %195 = vst.msk [vmem:[#allocation2] sm:$0xff] %vm149_vm1, %v193_v46 }
 0x21c   :  { %v194_v48 = vadd.f32 %v224_v42, %v185_v47 }
 0x21e   :  { %196 = vst.msk [vmem:[#allocation2 + $0x8] sm:$0xff] %vm149_vm1, %v194_v48 }
 0x21f   :  { %283 = shalt.err (!%p280_p4)
}
 0x220   :  { %s297_s4 = smov 128   ;;  %s298_s5 = smov 8  }
 0x221   :  { %208 = dma.vmem_to_hbm [thread:$0]  %s203_s22, 256, %s391_s6, [#allocation3], %s297_s4, %s297_s4, %s298_s5  }
 0x222   :  { %292 = dma.done.wait [#allocation3], 256  }
 0x223   :  { %293 = vsyncadd [#allocation3], 4294967040 }
 0x224   :  { %212 = vsyncpa [#allocation3], 1 }

</bundles_post_ra>
